<compile_context>
chip_gen: v7x
topology: tpu7x:2x2x1
jax: 0.10.0
libtpu: 0.0.40
codegen_flags: <defaults>
</compile_context>

<pallas_src>
import jax
import jax.numpy as jnp
from jax.experimental import pallas as pl
from jax.experimental.pallas import tpu as pltpu


def _two_layer_fc_kernel(x_ref, w1_ref, b1_ref, w2_ref, b2_ref, w3_ref, b3_ref, o_ref):
    # Fused MLP hot path: three MXU matmuls (bf16 operands, f32 accumulate) + VPU
    # bias/relu in f32. Everything for one batch tile is resident in VMEM.
    x = x_ref[...]
    h1 = jnp.dot(x, w1_ref[...], preferred_element_type=jnp.float32) + b1_ref[...]
    h1 = jnp.maximum(h1, 0.0).astype(w2_ref.dtype)
    h2 = jnp.dot(h1, w2_ref[...], preferred_element_type=jnp.float32) + b2_ref[...]
    h2 = jnp.maximum(h2, 0.0).astype(w3_ref.dtype)
    out = jnp.dot(h2, w3_ref[...], preferred_element_type=jnp.float32) + b3_ref[...]
    o_ref[...] = out.astype(o_ref.dtype)


def _round_up(x, m):
    return ((x + m - 1) // m) * m


def two_layer_fc(x, params, *, tile_b=512, compute_dtype=jnp.bfloat16):
    """Run the fused MLP Pallas kernel.

    x: (B, num_in) float32
    params: dict with w1 (num_in, H), b1 (1, H), w2 (H, H), b2 (1, H),
            w3 (H, num_out), b3 (1, num_out)   (float32)
    returns: (B, num_out) float32
    """
    w1, b1 = params["w1"], params["b1"]
    w2, b2 = params["w2"], params["b2"]
    w3, b3 = params["w3"], params["b3"]

    B, num_in = x.shape
    H = w1.shape[1]
    num_out = w3.shape[1]
    LANE = 128

    # Lane-dense output slab: pad the last Linear's output dim to a multiple of 128 so
    # the per-tile store is an unmasked vst; slice the real columns out at the end.
    out_pad = _round_up(num_out, LANE)
    if out_pad != num_out:
        w3 = jnp.pad(w3, ((0, 0), (0, out_pad - num_out)))
        b3 = jnp.pad(b3, ((0, 0), (0, out_pad - num_out)))

    # bf16 operands, f32 biases (added to the f32 accumulator).
    cd = compute_dtype
    xc = x.astype(cd)
    w1c, w2c, w3c = w1.astype(cd), w2.astype(cd), w3.astype(cd)
    b1f, b2f, b3f = b1.astype(jnp.float32), b2.astype(jnp.float32), b3.astype(jnp.float32)

    # Batch tiling. TB=512 keeps the per-step working set (~<2 MiB double-buffered,
    # weights ~25 KB) far below even v7x's 32 MiB scoped-VMEM default while amortizing
    # the ~0.35 us/step overhead. Round to 16 rows for bf16 sublane packing.
    TB = min(_round_up(tile_b, 16), _round_up(B, 16))
    B_pad = _round_up(B, TB)
    if B_pad != B:
        xc = jnp.pad(xc, ((0, B_pad - B), (0, 0)))
    grid = (B_pad // TB,)

    resident = lambda a: pl.BlockSpec(a.shape, lambda i: (0, 0))  # stays in VMEM

    itemsize = lambda a: a.size * a.dtype.itemsize
    cost = pl.CostEstimate(
        flops=2 * B_pad * (num_in * H + H * H + H * out_pad),
        transcendentals=0,
        bytes_accessed=(itemsize(xc) + itemsize(w1c) + itemsize(w2c) + itemsize(w3c)
                        + itemsize(b1f) + itemsize(b2f) + itemsize(b3f)
                        + B_pad * out_pad * 4),
    )

    out = pl.pallas_call(
        _two_layer_fc_kernel,
        out_shape=jax.ShapeDtypeStruct((B_pad, out_pad), jnp.float32),
        grid=grid,
        in_specs=[
            pl.BlockSpec((TB, num_in), lambda i: (i, 0)),   # x: tiled over batch
            resident(w1c), resident(b1f),
            resident(w2c), resident(b2f),
            resident(w3c), resident(b3f),
        ],
        out_specs=pl.BlockSpec((TB, out_pad), lambda i: (i, 0)),
        compiler_params=pltpu.CompilerParams(
            dimension_semantics=("parallel",),              # megacore on v7x
        ),
        cost_estimate=cost,
    )(xc, w1c, b1f, w2c, b2f, w3c, b3f)

    return out[:B, :num_out]


def init_params(key, num_in, num_out, hidden_dim):
    # Deterministic init mimicking torch.nn.Linear's U(-1/sqrt(fan_in), 1/sqrt(fan_in)).
    ks = jax.random.split(key, 6)

    def lin(kw, kb, fan_in, fan_out):
        bound = 1.0 / jnp.sqrt(fan_in)
        w = jax.random.uniform(kw, (fan_in, fan_out), jnp.float32, -bound, bound)
        b = jax.random.uniform(kb, (1, fan_out), jnp.float32, -bound, bound)
        return w, b

    w1, b1 = lin(ks[0], ks[1], num_in, hidden_dim)
    w2, b2 = lin(ks[2], ks[3], hidden_dim, hidden_dim)
    w3, b3 = lin(ks[4], ks[5], hidden_dim, num_out)
    return {"w1": w1, "b1": b1, "w2": w2, "b2": b2, "w3": w3, "b3": b3}


def two_layer_fc_ref(x, p, compute_dtype=jnp.bfloat16):
    # Reference with the same bf16-operand / f32-accumulate arithmetic as the kernel.
    cd = compute_dtype
    h1 = jnp.dot(x.astype(cd), p["w1"].astype(cd),
                 preferred_element_type=jnp.float32) + p["b1"]
    h1 = jnp.maximum(h1, 0.0)
    h2 = jnp.dot(h1.astype(cd), p["w2"].astype(cd),
                 preferred_element_type=jnp.float32) + p["b2"]
    h2 = jnp.maximum(h2, 0.0)
    return jnp.dot(h2.astype(cd), p["w3"].astype(cd),
                   preferred_element_type=jnp.float32) + p["b3"]


def two_layer_fc_ref_f32(x, p):
    h1 = jnp.maximum(x @ p["w1"] + p["b1"], 0.0)
    h2 = jnp.maximum(h1 @ p["w2"] + p["b2"], 0.0)
    return h2 @ p["w3"] + p["b3"]


if __name__ == "__main__":
    key = jax.random.PRNGKey(0)
    kx, kp = jax.random.split(key)

    batch, num_in, num_out, hidden_dim = 8, 16, 4, 64
    x = jax.random.normal(kx, (batch, num_in), jnp.float32)
    params = init_params(kp, num_in, num_out, hidden_dim)

    out = jax.block_until_ready(two_layer_fc(x, params))
    assert out.shape == (batch, num_out)

    # Matches the bf16-compute reference tightly, and the pure-f32 reference within
    # bf16-level tolerance.
    ref_bf16 = two_layer_fc_ref(x, params)
    ref_f32 = two_layer_fc_ref_f32(x, params)
    assert jnp.allclose(out, ref_bf16, atol=1e-2, rtol=1e-2), \
        float(jnp.max(jnp.abs(out - ref_bf16)))
    assert jnp.allclose(out, ref_f32, atol=1e-1, rtol=1e-1), \
        float(jnp.max(jnp.abs(out - ref_f32)))
    print("KERNEL_OK")
</pallas_src>

<mosaic_0001>
module attributes {stable_mosaic.version = 11 : i64} {
  func.func @_two_layer_fc_kernel(%arg0: i32, %arg1: memref<16x16xbf16, #tpu.memory_space<vmem>>, %arg2: memref<16x64xbf16, #tpu.memory_space<vmem>>, %arg3: memref<1x64xf32, #tpu.memory_space<vmem>>, %arg4: memref<64x64xbf16, #tpu.memory_space<vmem>>, %arg5: memref<1x64xf32, #tpu.memory_space<vmem>>, %arg6: memref<64x128xbf16, #tpu.memory_space<vmem>>, %arg7: memref<1x128xf32, #tpu.memory_space<vmem>>, %arg8: memref<16x128xf32, #tpu.memory_space<vmem>>) attributes {dimension_semantics = [#tpu.dimension_semantics<parallel>], iteration_bounds = array<i64: 1>, scalar_prefetch = 0 : i64, scratch_operands = 0 : i64, tpu.core_type = #tpu.core_type<tc>, window_params = [{transform_indices = @transform_0, window_bounds = array<i64: 16, 16>}, {pipeline_mode = #tpu.pipeline_mode<synchronous>, transform_indices = @transform_1, window_bounds = array<i64: 16, 64>}, {pipeline_mode = #tpu.pipeline_mode<synchronous>, transform_indices = @transform_2, window_bounds = array<i64: 1, 64>}, {pipeline_mode = #tpu.pipeline_mode<synchronous>, transform_indices = @transform_3, window_bounds = array<i64: 64, 64>}, {pipeline_mode = #tpu.pipeline_mode<synchronous>, transform_indices = @transform_4, window_bounds = array<i64: 1, 64>}, {pipeline_mode = #tpu.pipeline_mode<synchronous>, transform_indices = @transform_5, window_bounds = array<i64: 64, 128>}, {pipeline_mode = #tpu.pipeline_mode<synchronous>, transform_indices = @transform_6, window_bounds = array<i64: 1, 128>}, {transform_indices = @transform_7, window_bounds = array<i64: 16, 128>}]} {
    %c0 = arith.constant 0 : index
    %c0_0 = arith.constant 0 : index
    %0 = vector.load %arg1[%c0, %c0_0] : memref<16x16xbf16, #tpu.memory_space<vmem>>, vector<16x16xbf16>
    %c0_1 = arith.constant 0 : index
    %c0_2 = arith.constant 0 : index
    %1 = vector.load %arg2[%c0_1, %c0_2] : memref<16x64xbf16, #tpu.memory_space<vmem>>, vector<16x64xbf16>
    %cst = arith.constant dense<0.000000e+00> : vector<16x64xf32>
    %2 = tpu.matmul %0, %1, %cst {dimension_numbers = #tpu.dot_dimension_numbers<[1], [0], [0], [1], [0, 0, 1, 1], [], []>} : vector<16x16xbf16>, vector<16x64xbf16>, vector<16x64xf32> -> vector<16x64xf32>
    %c0_3 = arith.constant 0 : index
    %c0_4 = arith.constant 0 : index
    %3 = vector.load %arg3[%c0_3, %c0_4] : memref<1x64xf32, #tpu.memory_space<vmem>>, vector<1x64xf32>
    %4 = vector.broadcast %3 : vector<1x64xf32> to vector<16x64xf32>
    %5 = arith.addf %2, %4 : vector<16x64xf32>
    %cst_5 = arith.constant 0.000000e+00 : f32
    %6 = vector.broadcast %cst_5 : f32 to vector<16x64xf32>
    %7 = arith.maximumf %5, %6 : vector<16x64xf32>
    %8 = arith.truncf %7 : vector<16x64xf32> to vector<16x64xbf16>
    %c0_6 = arith.constant 0 : index
    %c0_7 = arith.constant 0 : index
    %9 = vector.load %arg4[%c0_6, %c0_7] : memref<64x64xbf16, #tpu.memory_space<vmem>>, vector<64x64xbf16>
    %cst_8 = arith.constant dense<0.000000e+00> : vector<16x64xf32>
    %10 = tpu.matmul %8, %9, %cst_8 {dimension_numbers = #tpu.dot_dimension_numbers<[1], [0], [0], [1], [0, 0, 1, 1], [], []>} : vector<16x64xbf16>, vector<64x64xbf16>, vector<16x64xf32> -> vector<16x64xf32>
    %c0_9 = arith.constant 0 : index
    %c0_10 = arith.constant 0 : index
    %11 = vector.load %arg5[%c0_9, %c0_10] : memref<1x64xf32, #tpu.memory_space<vmem>>, vector<1x64xf32>
    %12 = vector.broadcast %11 : vector<1x64xf32> to vector<16x64xf32>
    %13 = arith.addf %10, %12 : vector<16x64xf32>
    %cst_11 = arith.constant 0.000000e+00 : f32
    %14 = vector.broadcast %cst_11 : f32 to vector<16x64xf32>
    %15 = arith.maximumf %13, %14 : vector<16x64xf32>
    %16 = arith.truncf %15 : vector<16x64xf32> to vector<16x64xbf16>
    %c0_12 = arith.constant 0 : index
    %c0_13 = arith.constant 0 : index
    %17 = vector.load %arg6[%c0_12, %c0_13] : memref<64x128xbf16, #tpu.memory_space<vmem>>, vector<64x128xbf16>
    %cst_14 = arith.constant dense<0.000000e+00> : vector<16x128xf32>
    %18 = tpu.matmul %16, %17, %cst_14 {dimension_numbers = #tpu.dot_dimension_numbers<[1], [0], [0], [1], [0, 0, 1, 1], [], []>} : vector<16x64xbf16>, vector<64x128xbf16>, vector<16x128xf32> -> vector<16x128xf32>
    %c0_15 = arith.constant 0 : index
    %c0_16 = arith.constant 0 : index
    %19 = vector.load %arg7[%c0_15, %c0_16] : memref<1x128xf32, #tpu.memory_space<vmem>>, vector<1x128xf32>
    %20 = vector.broadcast %19 : vector<1x128xf32> to vector<16x128xf32>
    %21 = arith.addf %18, %20 : vector<16x128xf32>
    %c0_17 = arith.constant 0 : index
    %c0_18 = arith.constant 0 : index
    %22 = vector.load %arg8[%c0_17, %c0_18] : memref<16x128xf32, #tpu.memory_space<vmem>>, vector<16x128xf32>
    tpu.vector_store %arg8[%c0_17, %c0_18], %21 {strides = array<i32>} : memref<16x128xf32, #tpu.memory_space<vmem>>, vector<16x128xf32>,
    return
  }
  func.func @transform_0(%arg0: i32) -> (i32, i32) {
    %c0_i32 = arith.constant 0 : i32
    %c0_i32_0 = arith.constant 0 : i32
    return %arg0, %c0_i32 : i32, i32
  }
  func.func @transform_1(%arg0: i32) -> (i32, i32) {
    %c0_i32 = arith.constant 0 : i32
    %c0_i32_0 = arith.constant 0 : i32
    %c0_i32_1 = arith.constant 0 : i32
    return %c0_i32, %c0_i32_0 : i32, i32
  }
  func.func @transform_2(%arg0: i32) -> (i32, i32) {
    %c0_i32 = arith.constant 0 : i32
    %c0_i32_0 = arith.constant 0 : i32
    %c0_i32_1 = arith.constant 0 : i32
    return %c0_i32, %c0_i32_0 : i32, i32
  }
  func.func @transform_3(%arg0: i32) -> (i32, i32) {
    %c0_i32 = arith.constant 0 : i32
    %c0_i32_0 = arith.constant 0 : i32
    %c0_i32_1 = arith.constant 0 : i32
    return %c0_i32, %c0_i32_0 : i32, i32
  }
  func.func @transform_4(%arg0: i32) -> (i32, i32) {
    %c0_i32 = arith.constant 0 : i32
    %c0_i32_0 = arith.constant 0 : i32
    %c0_i32_1 = arith.constant 0 : i32
    return %c0_i32, %c0_i32_0 : i32, i32
  }
  func.func @transform_5(%arg0: i32) -> (i32, i32) {
    %c0_i32 = arith.constant 0 : i32
    %c0_i32_0 = arith.constant 0 : i32
    %c0_i32_1 = arith.constant 0 : i32
    return %c0_i32, %c0_i32_0 : i32, i32
  }
  func.func @transform_6(%arg0: i32) -> (i32, i32) {
    %c0_i32 = arith.constant 0 : i32
    %c0_i32_0 = arith.constant 0 : i32
    %c0_i32_1 = arith.constant 0 : i32
    return %c0_i32, %c0_i32_0 : i32, i32
  }
  func.func @transform_7(%arg0: i32) -> (i32, i32) {
    %c0_i32 = arith.constant 0 : i32
    %c0_i32_0 = arith.constant 0 : i32
    return %arg0, %c0_i32 : i32, i32
  }
}

</mosaic_0001>

<bundles_post_ra>
// kernel: tpu_custom_call.1
= control target key start
LH: loop header
LB: loop body
LE: loop exit
PB: predicated region body
PF: predicated region fallthrough
CT: control target
= control target key end

     0   :  { %12 = vsyncpa [#allocation3], 0  ;;  %s689_s0 = inlined_call_operand.hbm [shape: bf16[16,16], index: 0, kind: input, shape index: {}]   ;;  %s690_s1 = inlined_call_operand.hbm [shape: bf16[16,64], index: 1, kind: input, shape index: {}]   ;;  %s691_s2 = inlined_call_operand.vmem [shape: f32[1,64], index: 2, kind: input, shape index: {}]   ;;  %s692_s3 = inlined_call_operand.hbm [shape: bf16[64,64], index: 3, kind: input, shape index: {}]   ;;  %s693_s4 = inlined_call_operand.vmem [shape: f32[1,64], index: 4, kind: input, shape index: {}]   ;;  %s694_s5 = inlined_call_operand.hbm [shape: bf16[64,128], index: 5, kind: input, shape index: {}]   ;;  %s695_s6 = inlined_call_operand.vmem [shape: f32[1,128], index: 6, kind: input, shape index: {}]   ;;  %s696_s7 = inlined_call_operand.hbm [shape: f32[16,128], index: 7, kind: output, shape index: {}]  }
   0x1   :  { %13 = vsyncpa [#allocation6], 0 }
   0x2   :  { %14 = vsyncpa [#allocation9], 0 }
   0x3   :  { %15 = vsyncpa [#allocation4], 0  ;;  %s541_s24 = smov [#allocation5]   ;;  %s542_s26 = smov [#allocation2]  }
   0x4   :  { %s33_s25 = sshll.u32 %s541_s24, 4  ;;  %s21_s27 = sshll.u32 %s542_s26, 4  ;;  %s34_s25 = int_to_ptr.vmem [resolvable:$true] %s33_s25  ;;  %s592_s27 = int_to_ptr.vmem [resolvable:$true] %s21_s27 }
   0x5   :  { %s423_s30 = scalar_lea.hbm %s690_s1, 128 }
   0x6   :  { %p424_p0 = scmp.ne.s32.totalorder %s690_s1, %s423_s30  ;;  %p427_p1 = scmp.lt.u32.totalorder %s423_s30, %s690_s1 }
   0x8   :  { %p429_p2 = pnand %p427_p1, %p424_p0 }
   0xa   :  { %432 = shalt.err (!%p429_p2)
}
   0xb   :  { %s433_s12 = scalar_lea.vmem %s34_s25, 128  ;;  %p438_p4 = scmp.lt.s32.totalorder %s34_s25, %s34_s25 }
   0xc   :  { %p434_p3 = scmp.ne.s32.totalorder %s34_s25, %s433_s12  ;;  %p439_p5 = scmp.lt.s32.totalorder %s433_s12, %s433_s12 }
   0xe   :  { %p440_p6 = por %p439_p5, %p438_p4 }
  0x10   :  { %p441_p7 = pnand %p440_p6, %p434_p3 }
  0x12   :  { %444 = shalt.err (!%p441_p7)
}
  0x13   :  { %s543_s13 = smov 64   ;;  %s544_s14 = smov 4  }
  0x14   :  { %39 = dma.hbm_to_vmem [thread:$0]  %s690_s1, 128, %s34_s25, [#allocation6], %s543_s13, %s543_s13, %s544_s14  }
  0x15   :  { %s445_s19 = scalar_lea.hbm %s689_s0, 128 }
  0x16   :  { %p446_p8 = scmp.ne.s32.totalorder %s689_s0, %s445_s19  ;;  %p449_p9 = scmp.lt.u32.totalorder %s445_s19, %s689_s0 }
  0x18   :  { %p451_p10 = pnand %p449_p9, %p446_p8 }
  0x1a   :  { %454 = shalt.err (!%p451_p10)
}
  0x1b   :  { %s455_s24 = scalar_lea.vmem %s592_s27, 128  ;;  %p460_p12 = scmp.lt.s32.totalorder %s592_s27, %s592_s27 }
  0x1c   :  { %p456_p11 = scmp.ne.s32.totalorder %s592_s27, %s455_s24  ;;  %p461_p13 = scmp.lt.s32.totalorder %s455_s24, %s455_s24 }
  0x1e   :  { %p462_p0 = por %p461_p13, %p460_p12 }
  0x20   :  { %p463_p1 = pnand %p462_p0, %p456_p11 }
  0x22   :  { %466 = shalt.err (!%p463_p1)
}
  0x23   :  { %27 = dma.hbm_to_vmem [thread:$0]  %s689_s0, 128, %s592_s27, [#allocation3], %s543_s13, %s543_s13, %s544_s14  }
  0x24   :  { %s545_s26 = smov [#allocation7]   ;;  %s546_s29 = smov [#allocation8]  }
  0x25   :  { %s47_s28 = sshll.u32 %s545_s26, 4  ;;  %s61_s30 = sshll.u32 %s546_s29, 4  ;;  %s48_s28 = int_to_ptr.vmem [resolvable:$true] %s47_s28  ;;  %s629_s30 = int_to_ptr.vmem [resolvable:$true] %s61_s30 }
  0x26   :  { %s467_s10 = scalar_lea.hbm %s692_s3, 512 }
  0x27   :  { %p468_p2 = scmp.ne.s32.totalorder %s692_s3, %s467_s10  ;;  %p471_p3 = scmp.lt.u32.totalorder %s467_s10, %s692_s3 }
  0x29   :  { %p473_p4 = pnand %p471_p3, %p468_p2 }
  0x2b   :  { %476 = shalt.err (!%p473_p4)
}
  0x2c   :  { %s477_s0 = scalar_lea.vmem %s48_s28, 512  ;;  %p482_p6 = scmp.lt.s32.totalorder %s48_s28, %s48_s28 }
  0x2d   :  { %p478_p5 = scmp.ne.s32.totalorder %s48_s28, %s477_s0  ;;  %p483_p7 = scmp.lt.s32.totalorder %s477_s0, %s477_s0 }
  0x2f   :  { %p484_p8 = por %p483_p7, %p482_p6 }
  0x31   :  { %p485_p9 = pnand %p484_p8, %p478_p5 }
  0x33   :  { %488 = shalt.err (!%p485_p9)
}
  0x34   :  { %53 = dma.hbm_to_vmem [thread:$0]  %s692_s3, 512, %s48_s28, [#allocation6], %s543_s13, %s543_s13, %s544_s14  }
  0x35   :  { %s489_s20 = scalar_lea.hbm %s694_s5, 512 }
  0x36   :  { %p490_p10 = scmp.ne.s32.totalorder %s694_s5, %s489_s20  ;;  %p493_p11 = scmp.lt.u32.totalorder %s489_s20, %s694_s5 }
  0x38   :  { %p495_p12 = pnand %p493_p11, %p490_p10 }
  0x3a   :  { %498 = shalt.err (!%p495_p12)
}
  0x3b   :  { %s499_s1 = scalar_lea.vmem %s629_s30, 512  ;;  %p504_p0 = scmp.lt.s32.totalorder %s629_s30, %s629_s30 }
  0x3c   :  { %p500_p13 = scmp.ne.s32.totalorder %s629_s30, %s499_s1  ;;  %p505_p1 = scmp.lt.s32.totalorder %s499_s1, %s499_s1 }
  0x3e   :  { %p506_p2 = por %p505_p1, %p504_p0 }
  0x40   :  { %p507_p3 = pnand %p506_p2, %p500_p13 }
  0x42   :  { %510 = shalt.err (!%p507_p3)
}
  0x43   :  { %67 = dma.hbm_to_vmem [thread:$0]  %s694_s5, 512, %s629_s30, [#allocation9], %s543_s13, %s543_s13, %s544_s14  }
  0x44   :  { %533 = dma.done.wait [#allocation3], 128  }
  0x45   :  { %534 = vsyncadd [#allocation3], 4294967168 }
  0x46   :  { %535 = dma.done.wait [#allocation6], 640  }
  0x47   :  { %536 = vsyncadd [#allocation6], 4294966656 }
  0x48   :  { %537 = dma.done.wait [#allocation9], 512  }
  0x49   :  { %538 = vsyncadd [#allocation9], 4294966784  ;;  %v547_v0 = vmov 0.0   ;;  %vm548_vm0 = vmmov 0   ;;  %v413_v1 = vld [vmem:[#allocation5] sm:$0xff]   ;;  %v414_v2 = vld [vmem:[#allocation2] sm:$0xff]  }
  0x4a   :  { %372 = vmatprep.subr.bf16.mxu0 %v547_v0  ;;  %374 = vmatprep.mubr.msk.bf16.mxu0 %vm548_vm0, %v547_v0  ;;  %vm105_vm1 = vcmask 130048   ;;  %v415_v3 = vld [vmem:[#allocation7] sm:$0xff]   ;;  %v416_v4 = vld [vmem:[#allocation7 + $0x8] sm:$0xff]   ;;  %v417_v5 = vld [vmem:[#allocation7 + $0x10] sm:$0xff]   ;;  %vm192_vm2 = vcmask 523264   ;;  %s549_s29 = smov [#allocation10]  }
  0x4b   :  { %378 = vmatprep.subr.bf16.mxu1 %v547_v0  ;;  %386 = vmatprep.mubr.msk.bf16.mxu1 %vm548_vm0, %v547_v0  ;;  %v418_v6 = vld [vmem:[#allocation7 + $0x18] sm:$0xff]   ;;  %v419_v7 = vld [vmem:[#allocation8] sm:$0xff]   ;;  %v420_v8 = vld [vmem:[#allocation8 + $0x8] sm:$0xff]   ;;  %s330_s30 = sshll.u32 %s549_s29, 4  ;;  %s331_s30 = int_to_ptr.vmem [resolvable:$true] %s330_s30 }
  0x4c   :  { %373 = vmatpush3.bf16.msra.mxu0 %v413_v1  ;;  %379 = vmatpush3.bf16.msra.mxu1 %v415_v3  ;;  %v344_v9 = vld [vmem:[%s691_s2] ss:$0 sm:$0xff]  ;;  %v422_v20 = vld [vmem:[#allocation8 + $0x18] sm:$0xff]   ;;  %p516_p5 = scmp.lt.s32.totalorder %s331_s30, %s331_s30 }
  0x4d   :  { %390 = vmatprep.subr.bf16.mxu0 %v547_v0  ;;  %380 = vmatprep.subr.bf16.mxu1 %v547_v0  ;;  %v421_v19 = vld [vmem:[#allocation8 + $0x10] sm:$0xff]  }
  0x4e   :  { %v348_v21 = vld [vmem:[%s693_s4] ss:$0 sm:$0xff]  ;;  %s511_s4 = scalar_lea.vmem %s331_s30, 256 }
  0x4f   :  { %375 = vmatmul.mubr.msk.bf16.vlgmr.msra.gmra.mrb[0].mxu0 %vm105_vm1, %v414_v2  ;;  %v354_v31 = vld [vmem:[%s695_s6] ss:$0 sm:$0xff]  ;;  %p512_p4 = scmp.ne.s32.totalorder %s331_s30, %s511_s4  ;;  %p517_p6 = scmp.lt.s32.totalorder %s511_s4, %s511_s4 }
  0x50   :  { %398 = vmatprep.mubr.msk.bf16.mxu0 %vm548_vm0, %v547_v0  ;;  %381 = vmatpush3.bf16.msra.mxu1 %v416_v4 }
  0x51   :  { %382 = vmatprep.subr.bf16.mxu1 %v547_v0  ;;  %391 = vmatpush3.bf16.msra.mxu0 %v419_v7  ;;  %p518_p7 = por %p517_p6, %p516_p5 }
  0x52   :  { %392 = vmatprep.subr.bf16.mxu0 %v547_v0 }
  0x53   :  { %p519_p8 = pnand %p518_p7, %p512_p4 }
  0x54   :  { %383 = vmatpush3.bf16.msra.mxu1 %v417_v5 }
  0x55   :  { %384 = vmatprep.subr.bf16.mxu1 %v547_v0  ;;  %393 = vmatpush3.bf16.msra.mxu0 %v420_v8 }
  0x56   :  { %394 = vmatprep.subr.bf16.mxu0 %v547_v0 }
  0x58   :  { %385 = vmatpush3.bf16.msra.mxu1 %v418_v6 }
  0x59   :  { %395 = vmatpush3.bf16.msra.mxu0 %v421_v19 }
  0x5a   :  { %396 = vmatprep.subr.bf16.mxu0 %v547_v0 }
  0x5d   :  { %397 = vmatpush3.bf16.msra.mxu0 %v422_v20 }
 0x122   :  { %v143_v10 = vpop.f32.mrb[0].mxu0 }
 0x123   :  { %v144_v11 = vadd.f32 %v344_v9, %v143_v10  ;;  %v376_v12 = vpop.f32.mrb[1].mxu0 }
 0x124   :  { %v146_v13 = vpop.f32.mrb[2].mxu0 }
 0x125   :  { %v147_v14 = vadd.f32 %v344_v9, %v146_v13  ;;  %v377_v15 = vpop.f32.mrb[3].mxu0  ;;  %v150_v16 = vmax.f32 %v144_v11, 0.0 }
 0x127   :  { %v151_v17 = vmax.f32 %v147_v14, 0.0 }
 0x129   :  { %v152_v18 = vpack.c.bf16 %v151_v17, %v150_v16 }
 0x12b   :  { %387 = vmatmul.mubr.msk.bf16.vlgmr.msra.gmra.mrb[0].mxu1 %vm192_vm2, %v152_v18 }
 0x1fe   :  { %v230_v22 = vpop.f32.mrb[0].mxu1 }
 0x1ff   :  { %v231_v23 = vadd.f32 %v348_v21, %v230_v22  ;;  %v388_v24 = vpop.f32.mrb[1].mxu1 }
 0x200   :  { %v233_v25 = vpop.f32.mrb[2].mxu1 }
 0x201   :  { %v234_v26 = vadd.f32 %v348_v21, %v233_v25  ;;  %v389_v27 = vpop.f32.mrb[3].mxu1  ;;  %v237_v28 = vmax.f32 %v231_v23, 0.0 }
 0x203   :  { %v238_v29 = vmax.f32 %v234_v26, 0.0 }
 0x205   :  { %v239_v30 = vpack.c.bf16 %v238_v29, %v237_v28 }
 0x207   :  { %399 = vmatmul.mubr.msk.bf16.vlgmr.msra.gmra.mrb[4].mxu0 %vm192_vm2, %v239_v30 }
 0x2da   :  { %v316_v32 = vpop.f32.mrb[4].mxu0 }
 0x2db   :  { %v317_v33 = vadd.f32 %v354_v31, %v316_v32  ;;  %v400_v34 = vpop.f32.mrb[5].mxu0 }
 0x2dc   :  { %v319_v35 = vpop.f32.mrb[6].mxu0 }
 0x2dd   :  { %323 = vst [vmem:[#allocation10] sm:$0xff] %v317_v33  ;;  %v320_v36 = vadd.f32 %v354_v31, %v319_v35  ;;  %v401_v37 = vpop.f32.mrb[7].mxu0 }
 0x2df   :  { %324 = vst [vmem:[#allocation10 + $0x8] sm:$0xff] %v320_v36 }
 0x2e0   :  { %522 = shalt.err (!%p519_p8)
}
 0x2e1   :  { %s523_s9 = scalar_lea.hbm %s696_s7, 256 }
 0x2e2   :  { %p524_p9 = scmp.ne.s32.totalorder %s696_s7, %s523_s9  ;;  %p527_p10 = scmp.lt.u32.totalorder %s523_s9, %s696_s7 }
 0x2e4   :  { %p529_p11 = pnand %p527_p10, %p524_p9 }
 0x2e6   :  { %532 = shalt.err (!%p529_p11)
}
 0x2e7   :  { %s550_s16 = smov 128   ;;  %s551_s0 = smov 8  }
 0x2e8   :  { %336 = dma.vmem_to_hbm [thread:$0]  %s331_s30, 256, %s696_s7, [#allocation4], %s550_s16, %s550_s16, %s551_s0  }
 0x2e9   :  { %539 = dma.done.wait [#allocation4], 256  }
 0x2ea   :  { %540 = vsyncadd [#allocation4], 4294967040 }
 0x2eb   :  { %340 = vsyncpa [#allocation3], 1 }
 0x2ec   :  { %341 = vsyncpa [#allocation6], 1 }
 0x2ed   :  { %342 = vsyncpa [#allocation9], 1 }
 0x2ee   :  { %343 = vsyncpa [#allocation4], 1 }

</bundles_post_ra>
